<compile_context>
chip_gen: v7x
topology: tpu7x:2x2x1
jax: 0.10.0
libtpu: 0.0.40
codegen_flags: <defaults>
</compile_context>

<pallas_src>
import functools

import jax
import jax.numpy as jnp
import numpy as np
from jax import lax
from jax.experimental import pallas as pl
from jax.experimental.pallas import tpu as pltpu


def _round_up(n, m):
    return ((n + m - 1) // m) * m


# VMEM planning: keep double-buffered tiles well below every chip's limit
# (v7x: 64 MiB physical; v5e scoped default is only 16 MiB, so raise it).
_VMEM_LIMIT_BYTES = 48 * 1024 * 1024
_VMEM_TILE_BUDGET = 36 * 1024 * 1024
# Keep the register-resident hidden state within ~32 vregs (regfile = 64).
_H_REG_BUDGET_BYTES = 128 * 1024


def _rnn_kernel(p_ref, whh_ref, bias_ref, h0_ref, out_ref, h_scratch, *,
                t_block, t_last, output_last):
    """One grid step == t_block timesteps for one batch block.

    p_ref     : (t_block, b_blk, H_pad)  precomputed x @ W_xh (time-major)
    whh_ref   : (H_pad, H_pad)           recurrent weight (resident)
    bias_ref  : (8, H_pad)               bias, sublane-replicated
    h0_ref    : (b_blk, H_pad)           initial hidden for this batch block
    out_ref   : (t_block, b_blk, H_pad)  or (b_blk, H_pad) when output_last
    h_scratch : (b_blk, H_pad) VMEM      hidden carried across time blocks
    """
    tb = pl.program_id(1)  # time-block index (sequential axis)

    @pl.when(tb == 0)
    def _():
        h_scratch[...] = h0_ref[...]

    # Hoist the resident operands out of the time loop.
    whh = whh_ref[...]                          # compute dtype
    bias = bias_ref[0:1, :].astype(jnp.float32)  # (1, H_pad)

    # Hidden state is carried in registers across the unrolled loop; the VMEM
    # scratch is touched once per time block, not once per timestep.
    h_init = h_scratch[...]                     # f32 (b_blk, H_pad)

    def step(i, h):
        # Matmul runs in the compute dtype (bf16 by default), accumulation,
        # bias add and tanh stay in f32, as does the carried h.
        z = (p_ref[i].astype(jnp.float32) + bias
             + jnp.dot(h.astype(whh.dtype), whh,
                       preferred_element_type=jnp.float32))
        h_new = jnp.tanh(z)
        if output_last:
            # Resident (b_blk, H_pad) output, written only at the true last
            # timestep; padded tail timesteps never touch the output.
            @pl.when(tb * t_block + i == t_last)
            def _():
                out_ref[...] = h_new.astype(out_ref.dtype)
        else:
            # Dense, lane- and sublane-aligned (b_blk, H_pad) store per step;
            # the HBM writeback of the whole block happens once per grid step
            # via the pipelined out BlockSpec.
            out_ref[i] = h_new.astype(out_ref.dtype)
        return h_new

    h_final = lax.fori_loop(0, t_block, step, h_init,
                            unroll=min(8, t_block))
    h_scratch[...] = h_final


def rnn_forward(x, w_xh, w_hh, bias, memory=None, output_last=False,
                t_block=32, b_block=128, compute_dtype=jnp.bfloat16):
    """x: (B, T, D) -> hiddens (B, T, H), or last hidden if output_last."""
    B, T, D = x.shape
    H = w_hh.shape[0]
    if memory is None:
        memory = jnp.zeros((B, H), dtype=jnp.float32)  # rnn_cell.init_memory

    H_pad = _round_up(H, 128)
    c_size = jnp.dtype(compute_dtype).itemsize

    # ---- batch tile ---------------------------------------------------------
    B8 = _round_up(B, 8)
    b_blk = min(_round_up(b_block, 8), B8)
    # keep the register-carried hidden state within the vreg file
    b_cap = max(8, (_H_REG_BUDGET_BYTES // (4 * H_pad)) // 8 * 8)
    b_blk = min(b_blk, b_cap)
    # ensure >=2 batch blocks when the batch allows it (v7x 2-TC sharding)
    if B8 // b_blk < 2 and B8 >= 16:
        b_blk = max(8, _round_up((B8 + 1) // 2, 8))

    # ---- time tile ----------------------------------------------------------
    t_blk = max(1, min(t_block, T))

    # ---- shrink tiles to the VMEM budget (pipeline double-buffers blocks) ---
    def _vmem_bytes(tb, bb):
        w = 2 * H_pad * H_pad * c_size
        b_bias = 2 * 8 * H_pad * 4
        h0 = 2 * bb * H_pad * 4
        pbytes = 2 * tb * bb * H_pad * c_size
        obytes = 2 * (bb if output_last else tb * bb) * H_pad * 4
        scratch = bb * H_pad * 4
        return w + b_bias + h0 + pbytes + obytes + scratch

    while _vmem_bytes(t_blk, b_blk) > _VMEM_TILE_BUDGET and t_blk > 1:
        t_blk = max(1, t_blk // 2)
    while _vmem_bytes(t_blk, b_blk) > _VMEM_TILE_BUDGET and b_blk > 8:
        b_blk = max(8, _round_up(b_blk // 2, 8))

    B_pad = _round_up(B8, b_blk)
    T_pad = _round_up(T, t_blk)

    # ---- hoisted input projection: one big matmul, time-major output -------
    # Pad x (the smaller tensor) instead of materializing a padded copy of P.
    # Zero-padded W_xh/bias columns keep the padded H columns of P (and hence
    # of h) exactly zero through the recurrence; zero-padded batch rows and
    # tail timesteps only produce values that are discarded.
    if B_pad != B or T_pad != T:
        x = jnp.pad(x, ((0, B_pad - B), (0, T_pad - T), (0, 0)))
    w_xh_pad = jnp.zeros((D, H_pad), jnp.float32).at[:, :H].set(
        w_xh.astype(jnp.float32))
    p = jnp.einsum("btd,dh->tbh", x.astype(jnp.float32), w_xh_pad,
                   preferred_element_type=jnp.float32).astype(compute_dtype)

    whh_pad = jnp.zeros((H_pad, H_pad), compute_dtype).at[:H, :H].set(
        w_hh.astype(compute_dtype))
    bias_pad = jnp.zeros((8, H_pad), jnp.float32).at[:, :H].set(
        jnp.broadcast_to(bias.astype(jnp.float32).reshape(1, H), (8, H)))
    h0_pad = jnp.zeros((B_pad, H_pad), jnp.float32).at[:B, :H].set(
        memory.astype(jnp.float32))

    n_bb = B_pad // b_blk
    n_tb = T_pad // t_blk

    kernel = functools.partial(
        _rnn_kernel, t_block=t_blk, t_last=T - 1, output_last=output_last)

    if output_last:
        out_shape = jax.ShapeDtypeStruct((B_pad, H_pad), jnp.float32)
        out_spec = pl.BlockSpec((b_blk, H_pad), lambda b, t: (b, 0))
    else:
        out_shape = jax.ShapeDtypeStruct((T_pad, B_pad, H_pad), jnp.float32)
        out_spec = pl.BlockSpec((t_blk, b_blk, H_pad), lambda b, t: (t, b, 0))

    out = pl.pallas_call(
        kernel,
        out_shape=out_shape,
        grid_spec=pltpu.PrefetchScalarGridSpec(
            num_scalar_prefetch=0,
            grid=(n_bb, n_tb),
            in_specs=[
                pl.BlockSpec((t_blk, b_blk, H_pad), lambda b, t: (t, b, 0)),  # P
                pl.BlockSpec((H_pad, H_pad), lambda b, t: (0, 0)),            # W_hh
                pl.BlockSpec((8, H_pad), lambda b, t: (0, 0)),                # bias
                pl.BlockSpec((b_blk, H_pad), lambda b, t: (b, 0)),            # h0
            ],
            out_specs=out_spec,
            scratch_shapes=[pltpu.VMEM((b_blk, H_pad), jnp.float32)],          # carried h
        ),
        compiler_params=pltpu.CompilerParams(
            # batch blocks are independent (megacore-parallel); the time axis
            # carries the hidden state -> must stay sequential.
            dimension_semantics=("parallel", "arbitrary"),
            vmem_limit_bytes=_VMEM_LIMIT_BYTES,
        ),
    )(p, whh_pad, bias_pad, h0_pad)

    if output_last:
        # matches hiddens[-1].squeeze() in the PyTorch module
        return jnp.squeeze(out[:B, :H])
    # Kernel output is time-major (dense per-step stores); one XLA transpose
    # restores the PyTorch (B, T, H) convention.  A batch-major in-kernel
    # layout would require sublane-masked stores on every timestep of the
    # serial recurrence, which costs more than this single extra pass.
    return jnp.transpose(out[:T, :B, :H], (1, 0, 2))


def _rnn_reference(x, w_xh, w_hh, bias, memory=None, output_last=False):
    """Plain-JAX reference mirroring the PyTorch loop."""
    B, T, D = x.shape
    H = w_hh.shape[0]
    h = jnp.zeros((B, H), jnp.float32) if memory is None else memory
    hs = []
    for t in range(T):
        h = jnp.tanh(x[:, t, :] @ w_xh + h @ w_hh + bias)
        hs.append(h[:, None, :])
    if output_last:
        return jnp.squeeze(hs[-1])
    return jnp.concatenate(hs, axis=1)


if __name__ == "__main__":
    key = jax.random.PRNGKey(0)
    kx, kwx, kwh, kb = jax.random.split(key, 4)

    # Small shapes consistent with the module: (B, T, D), hidden size H.
    B, T, D, H = 2, 8, 16, 32
    x = jax.random.normal(kx, (B, T, D), dtype=jnp.float32)
    # deterministic parameter init (synthetic weights, no checkpoint)
    w_xh = jax.random.normal(kwx, (D, H), dtype=jnp.float32) * 0.1
    w_hh = jax.random.normal(kwh, (H, H), dtype=jnp.float32) * 0.1
    bias = jax.random.normal(kb, (H,), dtype=jnp.float32) * 0.1

    ref = _rnn_reference(x, w_xh, w_hh, bias)
    ref_last = _rnn_reference(x, w_xh, w_hh, bias, output_last=True)

    # 1) exact-precision path (f32 recurrent matmul), both output modes.
    out = jax.block_until_ready(
        rnn_forward(x, w_xh, w_hh, bias, compute_dtype=jnp.float32))
    assert out.shape == (B, T, H)
    assert np.allclose(np.asarray(out), np.asarray(ref), atol=1e-5, rtol=1e-5)

    out_last = jax.block_until_ready(
        rnn_forward(x, w_xh, w_hh, bias, output_last=True,
                    compute_dtype=jnp.float32))
    assert out_last.shape == (B, H)
    assert np.allclose(np.asarray(out_last), np.asarray(ref_last),
                       atol=1e-5, rtol=1e-5)

    # 2) performance default (bf16 matmul operands / P stream, f32 carry).
    out_bf16 = jax.block_until_ready(rnn_forward(x, w_xh, w_hh, bias))
    assert out_bf16.shape == (B, T, H)
    assert np.allclose(np.asarray(out_bf16), np.asarray(ref),
                       atol=2e-2, rtol=2e-2)

    # 3) multi-block grid with batch and time padding (2 batch blocks,
    #    ragged T -> padded tail timesteps), exact-precision check.
    B2, T2 = 24, 20
    x2 = jax.random.normal(kx, (B2, T2, D), dtype=jnp.float32)
    ref2 = _rnn_reference(x2, w_xh, w_hh, bias)
    ref2_last = _rnn_reference(x2, w_xh, w_hh, bias, output_last=True)
    out2 = jax.block_until_ready(
        rnn_forward(x2, w_xh, w_hh, bias, t_block=8,
                    compute_dtype=jnp.float32))
    assert out2.shape == (B2, T2, H)
    assert np.allclose(np.asarray(out2), np.asarray(ref2),
                       atol=1e-5, rtol=1e-5)
    out2_last = jax.block_until_ready(
        rnn_forward(x2, w_xh, w_hh, bias, output_last=True, t_block=8,
                    compute_dtype=jnp.float32))
    assert np.allclose(np.asarray(out2_last), np.asarray(ref2_last),
                       atol=1e-5, rtol=1e-5)

    print("KERNEL_OK")
</pallas_src>

<mosaic_0001>
module attributes {stable_mosaic.version = 11 : i64} {
  func.func @_rnn_kernel(%arg0: i32, %arg1: i32, %arg2: memref<8x8x128xf32, #tpu.memory_space<vmem>>, %arg3: memref<128x128xf32, #tpu.memory_space<vmem>>, %arg4: memref<8x128xf32, #tpu.memory_space<vmem>>, %arg5: memref<8x128xf32, #tpu.memory_space<vmem>>, %arg6: memref<8x8x128xf32, #tpu.memory_space<vmem>>, %arg7: memref<8x128xf32, #tpu.memory_space<vmem>>) attributes {dimension_semantics = [#tpu.dimension_semantics<parallel>, #tpu.dimension_semantics<arbitrary>], iteration_bounds = array<i64: 1, 1>, scalar_prefetch = 0 : i64, scratch_operands = 1 : i64, tpu.core_type = #tpu.core_type<tc>, window_params = [{transform_indices = @transform_0, window_bounds = array<i64: 8, 8, 128>}, {pipeline_mode = #tpu.pipeline_mode<synchronous>, transform_indices = @transform_1, window_bounds = array<i64: 128, 128>}, {pipeline_mode = #tpu.pipeline_mode<synchronous>, transform_indices = @transform_2, window_bounds = array<i64: 8, 128>}, {transform_indices = @transform_3, window_bounds = array<i64: 8, 128>}, {transform_indices = @transform_4, window_bounds = array<i64: 8, 8, 128>}]} {
    %c0_i32 = arith.constant 0 : i32
    %0 = arith.cmpi eq, %arg1, %c0_i32 : i32
    %1 = arith.extui %0 : i1 to i32
    %c0_i32_0 = arith.constant 0 : i32
    %2 = arith.cmpi ne, %1, %c0_i32_0 : i32
    scf.if %2 {
      %c0_48 = arith.constant 0 : index
      %c0_49 = arith.constant 0 : index
      %103 = vector.load %arg5[%c0_48, %c0_49] : memref<8x128xf32, #tpu.memory_space<vmem>>, vector<8x128xf32>
      %c0_50 = arith.constant 0 : index
      %c0_51 = arith.constant 0 : index
      %104 = vector.load %arg7[%c0_50, %c0_51] : memref<8x128xf32, #tpu.memory_space<vmem>>, vector<8x128xf32>
      tpu.vector_store %arg7[%c0_50, %c0_51], %103 {strides = array<i32>} : memref<8x128xf32, #tpu.memory_space<vmem>>, vector<8x128xf32>,
    } else {
    }
    %c0 = arith.constant 0 : index
    %c0_1 = arith.constant 0 : index
    %3 = vector.load %arg3[%c0, %c0_1] : memref<128x128xf32, #tpu.memory_space<vmem>>, vector<128x128xf32>
    %c0_2 = arith.constant 0 : index
    %c0_3 = arith.constant 0 : index
    %4 = vector.load %arg4[%c0_2, %c0_3] : memref<8x128xf32, #tpu.memory_space<vmem>>, vector<1x128xf32>
    %c0_4 = arith.constant 0 : index
    %c0_5 = arith.constant 0 : index
    %5 = vector.load %arg7[%c0_4, %c0_5] : memref<8x128xf32, #tpu.memory_space<vmem>>, vector<8x128xf32>
    %c0_i32_6 = arith.constant 0 : i32
    %6 = arith.index_cast %c0_i32_6 : i32 to index
    %c0_7 = arith.constant 0 : index
    %c0_8 = arith.constant 0 : index
    %7 = vector.load %arg2[%6, %c0_7, %c0_8] : memref<8x8x128xf32, #tpu.memory_space<vmem>>, vector<1x8x128xf32>
    %8 = vector.shape_cast %7 : vector<1x8x128xf32> to vector<8x128xf32>
    %9 = vector.broadcast %4 : vector<1x128xf32> to vector<8x128xf32>
    %10 = arith.addf %8, %9 : vector<8x128xf32>
    %cst = arith.constant dense<0.000000e+00> : vector<8x128xf32>
    %11 = tpu.matmul %5, %3, %cst {dimension_numbers = #tpu.dot_dimension_numbers<[1], [0], [0], [1], [0, 0, 1, 1], [], []>} : vector<8x128xf32>, vector<128x128xf32>, vector<8x128xf32> -> vector<8x128xf32>
    %12 = arith.addf %10, %11 : vector<8x128xf32>
    %13 = math.tanh %12 : vector<8x128xf32>
    %14 = arith.index_cast %c0_i32_6 : i32 to index
    %c0_9 = arith.constant 0 : index
    %c0_10 = arith.constant 0 : index
    %15 = vector.load %arg6[%14, %c0_9, %c0_10] : memref<8x8x128xf32, #tpu.memory_space<vmem>>, vector<1x8x128xf32>
    %16 = vector.shape_cast %15 : vector<1x8x128xf32> to vector<8x128xf32>
    %17 = vector.shape_cast %13 : vector<8x128xf32> to vector<1x8x128xf32>
    tpu.vector_store %arg6[%14, %c0_9, %c0_10], %17 {strides = array<i32>} : memref<8x8x128xf32, #tpu.memory_space<vmem>>, vector<1x8x128xf32>,
    %c1_i32 = arith.constant 1 : i32
    %18 = arith.index_cast %c1_i32 : i32 to index
    %c0_11 = arith.constant 0 : index
    %c0_12 = arith.constant 0 : index
    %19 = vector.load %arg2[%18, %c0_11, %c0_12] : memref<8x8x128xf32, #tpu.memory_space<vmem>>, vector<1x8x128xf32>
    %20 = vector.shape_cast %19 : vector<1x8x128xf32> to vector<8x128xf32>
    %21 = vector.broadcast %4 : vector<1x128xf32> to vector<8x128xf32>
    %22 = arith.addf %20, %21 : vector<8x128xf32>
    %cst_13 = arith.constant dense<0.000000e+00> : vector<8x128xf32>
    %23 = tpu.matmul %13, %3, %cst_13 {dimension_numbers = #tpu.dot_dimension_numbers<[1], [0], [0], [1], [0, 0, 1, 1], [], []>} : vector<8x128xf32>, vector<128x128xf32>, vector<8x128xf32> -> vector<8x128xf32>
    %24 = arith.addf %22, %23 : vector<8x128xf32>
    %25 = math.tanh %24 : vector<8x128xf32>
    %26 = arith.index_cast %c1_i32 : i32 to index
    %c0_14 = arith.constant 0 : index
    %c0_15 = arith.constant 0 : index
    %27 = vector.load %arg6[%26, %c0_14, %c0_15] : memref<8x8x128xf32, #tpu.memory_space<vmem>>, vector<1x8x128xf32>
    %28 = vector.shape_cast %27 : vector<1x8x128xf32> to vector<8x128xf32>
    %29 = vector.shape_cast %25 : vector<8x128xf32> to vector<1x8x128xf32>
    tpu.vector_store %arg6[%26, %c0_14, %c0_15], %29 {strides = array<i32>} : memref<8x8x128xf32, #tpu.memory_space<vmem>>, vector<1x8x128xf32>,
    %c2_i32 = arith.constant 2 : i32
    %30 = arith.index_cast %c2_i32 : i32 to index
    %c0_16 = arith.constant 0 : index
    %c0_17 = arith.constant 0 : index
    %31 = vector.load %arg2[%30, %c0_16, %c0_17] : memref<8x8x128xf32, #tpu.memory_space<vmem>>, vector<1x8x128xf32>
    %32 = vector.shape_cast %31 : vector<1x8x128xf32> to vector<8x128xf32>
    %33 = vector.broadcast %4 : vector<1x128xf32> to vector<8x128xf32>
    %34 = arith.addf %32, %33 : vector<8x128xf32>
    %cst_18 = arith.constant dense<0.000000e+00> : vector<8x128xf32>
    %35 = tpu.matmul %25, %3, %cst_18 {dimension_numbers = #tpu.dot_dimension_numbers<[1], [0], [0], [1], [0, 0, 1, 1], [], []>} : vector<8x128xf32>, vector<128x128xf32>, vector<8x128xf32> -> vector<8x128xf32>
    %36 = arith.addf %34, %35 : vector<8x128xf32>
    %37 = math.tanh %36 : vector<8x128xf32>
    %38 = arith.index_cast %c2_i32 : i32 to index
    %c0_19 = arith.constant 0 : index
    %c0_20 = arith.constant 0 : index
    %39 = vector.load %arg6[%38, %c0_19, %c0_20] : memref<8x8x128xf32, #tpu.memory_space<vmem>>, vector<1x8x128xf32>
    %40 = vector.shape_cast %39 : vector<1x8x128xf32> to vector<8x128xf32>
    %41 = vector.shape_cast %37 : vector<8x128xf32> to vector<1x8x128xf32>
    tpu.vector_store %arg6[%38, %c0_19, %c0_20], %41 {strides = array<i32>} : memref<8x8x128xf32, #tpu.memory_space<vmem>>, vector<1x8x128xf32>,
    %c3_i32 = arith.constant 3 : i32
    %42 = arith.index_cast %c3_i32 : i32 to index
    %c0_21 = arith.constant 0 : index
    %c0_22 = arith.constant 0 : index
    %43 = vector.load %arg2[%42, %c0_21, %c0_22] : memref<8x8x128xf32, #tpu.memory_space<vmem>>, vector<1x8x128xf32>
    %44 = vector.shape_cast %43 : vector<1x8x128xf32> to vector<8x128xf32>
    %45 = vector.broadcast %4 : vector<1x128xf32> to vector<8x128xf32>
    %46 = arith.addf %44, %45 : vector<8x128xf32>
    %cst_23 = arith.constant dense<0.000000e+00> : vector<8x128xf32>
    %47 = tpu.matmul %37, %3, %cst_23 {dimension_numbers = #tpu.dot_dimension_numbers<[1], [0], [0], [1], [0, 0, 1, 1], [], []>} : vector<8x128xf32>, vector<128x128xf32>, vector<8x128xf32> -> vector<8x128xf32>
    %48 = arith.addf %46, %47 : vector<8x128xf32>
    %49 = math.tanh %48 : vector<8x128xf32>
    %50 = arith.index_cast %c3_i32 : i32 to index
    %c0_24 = arith.constant 0 : index
    %c0_25 = arith.constant 0 : index
    %51 = vector.load %arg6[%50, %c0_24, %c0_25] : memref<8x8x128xf32, #tpu.memory_space<vmem>>, vector<1x8x128xf32>
    %52 = vector.shape_cast %51 : vector<1x8x128xf32> to vector<8x128xf32>
    %53 = vector.shape_cast %49 : vector<8x128xf32> to vector<1x8x128xf32>
    tpu.vector_store %arg6[%50, %c0_24, %c0_25], %53 {strides = array<i32>} : memref<8x8x128xf32, #tpu.memory_space<vmem>>, vector<1x8x128xf32>,
    %c4_i32 = arith.constant 4 : i32
    %54 = arith.index_cast %c4_i32 : i32 to index
    %c0_26 = arith.constant 0 : index
    %c0_27 = arith.constant 0 : index
    %55 = vector.load %arg2[%54, %c0_26, %c0_27] : memref<8x8x128xf32, #tpu.memory_space<vmem>>, vector<1x8x128xf32>
    %56 = vector.shape_cast %55 : vector<1x8x128xf32> to vector<8x128xf32>
    %57 = vector.broadcast %4 : vector<1x128xf32> to vector<8x128xf32>
    %58 = arith.addf %56, %57 : vector<8x128xf32>
    %cst_28 = arith.constant dense<0.000000e+00> : vector<8x128xf32>
    %59 = tpu.matmul %49, %3, %cst_28 {dimension_numbers = #tpu.dot_dimension_numbers<[1], [0], [0], [1], [0, 0, 1, 1], [], []>} : vector<8x128xf32>, vector<128x128xf32>, vector<8x128xf32> -> vector<8x128xf32>
    %60 = arith.addf %58, %59 : vector<8x128xf32>
    %61 = math.tanh %60 : vector<8x128xf32>
    %62 = arith.index_cast %c4_i32 : i32 to index
    %c0_29 = arith.constant 0 : index
    %c0_30 = arith.constant 0 : index
    %63 = vector.load %arg6[%62, %c0_29, %c0_30] : memref<8x8x128xf32, #tpu.memory_space<vmem>>, vector<1x8x128xf32>
    %64 = vector.shape_cast %63 : vector<1x8x128xf32> to vector<8x128xf32>
    %65 = vector.shape_cast %61 : vector<8x128xf32> to vector<1x8x128xf32>
    tpu.vector_store %arg6[%62, %c0_29, %c0_30], %65 {strides = array<i32>} : memref<8x8x128xf32, #tpu.memory_space<vmem>>, vector<1x8x128xf32>,
    %c5_i32 = arith.constant 5 : i32
    %66 = arith.index_cast %c5_i32 : i32 to index
    %c0_31 = arith.constant 0 : index
    %c0_32 = arith.constant 0 : index
    %67 = vector.load %arg2[%66, %c0_31, %c0_32] : memref<8x8x128xf32, #tpu.memory_space<vmem>>, vector<1x8x128xf32>
    %68 = vector.shape_cast %67 : vector<1x8x128xf32> to vector<8x128xf32>
    %69 = vector.broadcast %4 : vector<1x128xf32> to vector<8x128xf32>
    %70 = arith.addf %68, %69 : vector<8x128xf32>
    %cst_33 = arith.constant dense<0.000000e+00> : vector<8x128xf32>
    %71 = tpu.matmul %61, %3, %cst_33 {dimension_numbers = #tpu.dot_dimension_numbers<[1], [0], [0], [1], [0, 0, 1, 1], [], []>} : vector<8x128xf32>, vector<128x128xf32>, vector<8x128xf32> -> vector<8x128xf32>
    %72 = arith.addf %70, %71 : vector<8x128xf32>
    %73 = math.tanh %72 : vector<8x128xf32>
    %74 = arith.index_cast %c5_i32 : i32 to index
    %c0_34 = arith.constant 0 : index
    %c0_35 = arith.constant 0 : index
    %75 = vector.load %arg6[%74, %c0_34, %c0_35] : memref<8x8x128xf32, #tpu.memory_space<vmem>>, vector<1x8x128xf32>
    %76 = vector.shape_cast %75 : vector<1x8x128xf32> to vector<8x128xf32>
    %77 = vector.shape_cast %73 : vector<8x128xf32> to vector<1x8x128xf32>
    tpu.vector_store %arg6[%74, %c0_34, %c0_35], %77 {strides = array<i32>} : memref<8x8x128xf32, #tpu.memory_space<vmem>>, vector<1x8x128xf32>,
    %c6_i32 = arith.constant 6 : i32
    %78 = arith.index_cast %c6_i32 : i32 to index
    %c0_36 = arith.constant 0 : index
    %c0_37 = arith.constant 0 : index
    %79 = vector.load %arg2[%78, %c0_36, %c0_37] : memref<8x8x128xf32, #tpu.memory_space<vmem>>, vector<1x8x128xf32>
    %80 = vector.shape_cast %79 : vector<1x8x128xf32> to vector<8x128xf32>
    %81 = vector.broadcast %4 : vector<1x128xf32> to vector<8x128xf32>
    %82 = arith.addf %80, %81 : vector<8x128xf32>
    %cst_38 = arith.constant dense<0.000000e+00> : vector<8x128xf32>
    %83 = tpu.matmul %73, %3, %cst_38 {dimension_numbers = #tpu.dot_dimension_numbers<[1], [0], [0], [1], [0, 0, 1, 1], [], []>} : vector<8x128xf32>, vector<128x128xf32>, vector<8x128xf32> -> vector<8x128xf32>
    %84 = arith.addf %82, %83 : vector<8x128xf32>
    %85 = math.tanh %84 : vector<8x128xf32>
    %86 = arith.index_cast %c6_i32 : i32 to index
    %c0_39 = arith.constant 0 : index
    %c0_40 = arith.constant 0 : index
    %87 = vector.load %arg6[%86, %c0_39, %c0_40] : memref<8x8x128xf32, #tpu.memory_space<vmem>>, vector<1x8x128xf32>
    %88 = vector.shape_cast %87 : vector<1x8x128xf32> to vector<8x128xf32>
    %89 = vector.shape_cast %85 : vector<8x128xf32> to vector<1x8x128xf32>
    tpu.vector_store %arg6[%86, %c0_39, %c0_40], %89 {strides = array<i32>} : memref<8x8x128xf32, #tpu.memory_space<vmem>>, vector<1x8x128xf32>,
    %c7_i32 = arith.constant 7 : i32
    %90 = arith.index_cast %c7_i32 : i32 to index
    %c0_41 = arith.constant 0 : index
    %c0_42 = arith.constant 0 : index
    %91 = vector.load %arg2[%90, %c0_41, %c0_42] : memref<8x8x128xf32, #tpu.memory_space<vmem>>, vector<1x8x128xf32>
    %92 = vector.shape_cast %91 : vector<1x8x128xf32> to vector<8x128xf32>
    %93 = vector.broadcast %4 : vector<1x128xf32> to vector<8x128xf32>
    %94 = arith.addf %92, %93 : vector<8x128xf32>
    %cst_43 = arith.constant dense<0.000000e+00> : vector<8x128xf32>
    %95 = tpu.matmul %85, %3, %cst_43 {dimension_numbers = #tpu.dot_dimension_numbers<[1], [0], [0], [1], [0, 0, 1, 1], [], []>} : vector<8x128xf32>, vector<128x128xf32>, vector<8x128xf32> -> vector<8x128xf32>
    %96 = arith.addf %94, %95 : vector<8x128xf32>
    %97 = math.tanh %96 : vector<8x128xf32>
    %98 = arith.index_cast %c7_i32 : i32 to index
    %c0_44 = arith.constant 0 : index
    %c0_45 = arith.constant 0 : index
    %99 = vector.load %arg6[%98, %c0_44, %c0_45] : memref<8x8x128xf32, #tpu.memory_space<vmem>>, vector<1x8x128xf32>
    %100 = vector.shape_cast %99 : vector<1x8x128xf32> to vector<8x128xf32>
    %101 = vector.shape_cast %97 : vector<8x128xf32> to vector<1x8x128xf32>
    tpu.vector_store %arg6[%98, %c0_44, %c0_45], %101 {strides = array<i32>} : memref<8x8x128xf32, #tpu.memory_space<vmem>>, vector<1x8x128xf32>,
    %c8_i32 = arith.constant 8 : i32
    %c0_46 = arith.constant 0 : index
    %c0_47 = arith.constant 0 : index
    %102 = vector.load %arg7[%c0_46, %c0_47] : memref<8x128xf32, #tpu.memory_space<vmem>>, vector<8x128xf32>
    tpu.vector_store %arg7[%c0_46, %c0_47], %97 {strides = array<i32>} : memref<8x128xf32, #tpu.memory_space<vmem>>, vector<8x128xf32>,
    return
  }
  func.func @transform_0(%arg0: i32, %arg1: i32) -> (i32, i32, i32) {
    %c0_i32 = arith.constant 0 : i32
    %c0_i32_0 = arith.constant 0 : i32
    return %arg1, %arg0, %c0_i32 : i32, i32, i32
  }
  func.func @transform_1(%arg0: i32, %arg1: i32) -> (i32, i32) {
    %c0_i32 = arith.constant 0 : i32
    %c0_i32_0 = arith.constant 0 : i32
    %c0_i32_1 = arith.constant 0 : i32
    return %c0_i32, %c0_i32_0 : i32, i32
  }
  func.func @transform_2(%arg0: i32, %arg1: i32) -> (i32, i32) {
    %c0_i32 = arith.constant 0 : i32
    %c0_i32_0 = arith.constant 0 : i32
    %c0_i32_1 = arith.constant 0 : i32
    return %c0_i32, %c0_i32_0 : i32, i32
  }
  func.func @transform_3(%arg0: i32, %arg1: i32) -> (i32, i32) {
    %c0_i32 = arith.constant 0 : i32
    %c0_i32_0 = arith.constant 0 : i32
    return %arg0, %c0_i32 : i32, i32
  }
  func.func @transform_4(%arg0: i32, %arg1: i32) -> (i32, i32, i32) {
    %c0_i32 = arith.constant 0 : i32
    %c0_i32_0 = arith.constant 0 : i32
    return %arg1, %arg0, %c0_i32 : i32, i32, i32
  }
}

</mosaic_0001>

<bundles_post_ra>
// kernel: tpu_custom_call.1
= control target key start
LH: loop header
LB: loop body
LE: loop exit
PB: predicated region body
PF: predicated region fallthrough
CT: control target
= control target key end

     0   :  { %9 = vsyncpa [#allocation4], 0  ;;  %s1717_s0 = inlined_call_operand.hbm [shape: f32[8,8,128], index: 0, kind: input, shape index: {}]   ;;  %s1718_s1 = inlined_call_operand.hbm [shape: f32[128,128], index: 1, kind: input, shape index: {}]   ;;  %s1719_s2 = inlined_call_operand.hbm [shape: f32[8,128], index: 2, kind: input, shape index: {}]   ;;  %s1720_s3 = inlined_call_operand.vmem [shape: f32[8,128], index: 3, kind: input, shape index: {}]   ;;  %s1721_s4 = inlined_call_operand.hbm [shape: f32[8,8,128], index: 4, kind: output, shape index: {}]  }
   0x1   :  { %10 = vsyncpa [#allocation7], 0 }
   0x2   :  { %11 = vsyncpa [#allocation5], 0  ;;  %s1446_s15 = smov [#allocation6]   ;;  %s1447_s17 = smov [#allocation3]  }
   0x3   :  { %s29_s16 = sshll.u32 %s1446_s15, 4  ;;  %s17_s18 = sshll.u32 %s1447_s17, 4  ;;  %s30_s16 = int_to_ptr.vmem [resolvable:$true] %s29_s16  ;;  %s1480_s18 = int_to_ptr.vmem [resolvable:$true] %s17_s18 }
   0x4   :  { %s1352_s21 = scalar_lea.hbm %s1718_s1, 2048 }
   0x5   :  { %p1353_p0 = scmp.ne.s32.totalorder %s1718_s1, %s1352_s21  ;;  %p1356_p1 = scmp.lt.u32.totalorder %s1352_s21, %s1718_s1 }
   0x7   :  { %p1358_p2 = pnand %p1356_p1, %p1353_p0 }
   0x9   :  { %1361 = shalt.err (!%p1358_p2)
}
   0xa   :  { %s1362_s26 = scalar_lea.vmem %s30_s16, 2048  ;;  %p1367_p4 = scmp.lt.s32.totalorder %s30_s16, %s30_s16 }
   0xb   :  { %p1363_p3 = scmp.ne.s32.totalorder %s30_s16, %s1362_s26  ;;  %p1368_p5 = scmp.lt.s32.totalorder %s1362_s26, %s1362_s26 }
   0xd   :  { %p1369_p6 = por %p1368_p5, %p1367_p4 }
   0xf   :  { %p1370_p7 = pnand %p1369_p6, %p1363_p3 }
  0x11   :  { %1373 = shalt.err (!%p1370_p7)
}
  0x12   :  { %s1448_s27 = smov 128   ;;  %s1449_s28 = smov 8  }
  0x13   :  { %35 = dma.hbm_to_vmem [thread:$0]  %s1718_s1, 2048, %s30_s16, [#allocation7], %s1448_s27, %s1448_s27, %s1449_s28  }
  0x14   :  { %s1374_s7 = scalar_lea.hbm %s1717_s0, 1024 }
  0x15   :  { %p1375_p8 = scmp.ne.s32.totalorder %s1717_s0, %s1374_s7  ;;  %p1378_p9 = scmp.lt.u32.totalorder %s1374_s7, %s1717_s0 }
  0x17   :  { %p1380_p10 = pnand %p1378_p9, %p1375_p8 }
  0x19   :  { %1383 = shalt.err (!%p1380_p10)
}
  0x1a   :  { %s1384_s12 = scalar_lea.vmem %s1480_s18, 1024  ;;  %p1389_p12 = scmp.lt.s32.totalorder %s1480_s18, %s1480_s18 }
  0x1b   :  { %p1385_p11 = scmp.ne.s32.totalorder %s1480_s18, %s1384_s12  ;;  %p1390_p13 = scmp.lt.s32.totalorder %s1384_s12, %s1384_s12 }
  0x1d   :  { %p1391_p0 = por %p1390_p13, %p1389_p12 }
  0x1f   :  { %p1392_p1 = pnand %p1391_p0, %p1385_p11 }
  0x21   :  { %1395 = shalt.err (!%p1392_p1)
}
  0x22   :  { %23 = dma.hbm_to_vmem [thread:$0]  %s1717_s0, 1024, %s1480_s18, [#allocation4], %s1448_s27, %s1448_s27, %s1449_s28  }
  0x23   :  { %s1450_s14 = smov [#allocation8]   ;;  %s1396_s19 = scalar_lea.hbm %s1719_s2, 128 }
  0x24   :  { %s42_s15 = sshll.u32 %s1450_s14, 4  ;;  %p1397_p2 = scmp.ne.s32.totalorder %s1719_s2, %s1396_s19  ;;  %s43_s15 = int_to_ptr.vmem [resolvable:$true] %s42_s15 }
  0x25   :  { %p1400_p3 = scmp.lt.u32.totalorder %s1396_s19, %s1719_s2 }
  0x27   :  { %p1402_p4 = pnand %p1400_p3, %p1397_p2 }
  0x29   :  { %1405 = shalt.err (!%p1402_p4)
}
  0x2a   :  { %s1406_s24 = scalar_lea.vmem %s43_s15, 128  ;;  %p1411_p6 = scmp.lt.s32.totalorder %s43_s15, %s43_s15 }
  0x2b   :  { %p1407_p5 = scmp.ne.s32.totalorder %s43_s15, %s1406_s24  ;;  %p1412_p7 = scmp.lt.s32.totalorder %s1406_s24, %s1406_s24 }
  0x2d   :  { %p1413_p8 = por %p1412_p7, %p1411_p6 }
  0x2f   :  { %p1414_p9 = pnand %p1413_p8, %p1407_p5 }
  0x31   :  { %1417 = shalt.err (!%p1414_p9)
}
  0x32   :  { %45 = dma.hbm_to_vmem [thread:$0]  %s1719_s2, 128, %s43_s15, [#allocation7]  }
  0x33   :  { %1440 = dma.done.wait [#allocation4], 1024  }
  0x34   :  { %1441 = vsyncadd [#allocation4], 4294966272 }
  0x35   :  { %1442 = dma.done.wait [#allocation7], 2176  }
  0x36   :  { %1443 = vsyncadd [#allocation7], 4294965120  ;;  %v1451_v0 = vmov 0.0|0.0   ;;  %vm1452_vm0 = vmmov 0   ;;  %v1453_v1 = vmov 0.0   ;;  %v63_v2 = vld [vmem:[#allocation6] sm:$0xff] }
  0x37   :  { %1135 = vmatprep.subr.bf16.mxu0 %v1451_v0  ;;  %887 = vmatprep.mubr.msk.f32.mxu0 %vm1452_vm0, %v1453_v1  ;;  %v64_v3 = vld [vmem:[#allocation6 + $0x8] sm:$0xff]  ;;  %v65_v4 = vld [vmem:[#allocation6 + $0x10] sm:$0xff]  ;;  %v66_v6 = vld [vmem:[#allocation6 + $0x18] sm:$0xff] }
  0x38   :  { %1159 = vmatprep.subr.bf16.mxu1 %v1451_v0  ;;  %922 = vmatprep.mubr.msk.f32.mxu1 %vm1452_vm0, %v1453_v1  ;;  %v1535_v5 = vpack.c.bf16 %v64_v3, %v63_v2  ;;  %v1538_v7 = vpack.c.bf16 %v66_v6, %v65_v4  ;;  %v67_v8 = vld [vmem:[#allocation6 + $0x20] sm:$0xff]  ;;  %v68_v9 = vld [vmem:[#allocation6 + $0x28] sm:$0xff]  ;;  %v69_v11 = vld [vmem:[#allocation6 + $0x30] sm:$0xff] }
  0x39   :  { %v1544_v10 = vpack.c.bf16 %v68_v9, %v67_v8  ;;  %v70_v12 = vld [vmem:[#allocation6 + $0x38] sm:$0xff]  ;;  %v71_v14 = vld [vmem:[#allocation6 + $0x40] sm:$0xff]  ;;  %v72_v15 = vld [vmem:[#allocation6 + $0x48] sm:$0xff] }
  0x3a   :  { %1137 = vmatpush3.bf16.msra.mxu0 %v1535_v5  ;;  %1161 = vmatpush3.bf16.msra.mxu1 %v1535_v5  ;;  %v1550_v13 = vpack.c.bf16 %v70_v12, %v69_v11  ;;  %v1556_v16 = vpack.c.bf16 %v72_v15, %v71_v14  ;;  %v73_v17 = vld [vmem:[#allocation6 + $0x50] sm:$0xff]  ;;  %v74_v18 = vld [vmem:[#allocation6 + $0x58] sm:$0xff]  ;;  %v75_v20 = vld [vmem:[#allocation6 + $0x60] sm:$0xff] }
  0x3b   :  { %1138 = vmatprep.subr.bf16.mxu0 %v1451_v0  ;;  %1162 = vmatprep.subr.bf16.mxu1 %v1451_v0  ;;  %v1562_v19 = vpack.c.bf16 %v74_v18, %v73_v17  ;;  %v76_v21 = vld [vmem:[#allocation6 + $0x68] sm:$0xff]  ;;  %v77_v23 = vld [vmem:[#allocation6 + $0x70] sm:$0xff]  ;;  %v78_v24 = vld [vmem:[#allocation6 + $0x78] sm:$0xff] }
  0x3c   :  { %v1568_v22 = vpack.c.bf16 %v76_v21, %v75_v20  ;;  %v1574_v25 = vpack.c.bf16 %v78_v24, %v77_v23  ;;  %v61_v26 = vld [vmem:[%s1720_s3] sm:$0xff]  ;;  %v161_v34 = vld [vmem:[#allocation3 + $0x8] sm:$0xff]  ;;  %v238_v40 = vld [vmem:[#allocation3 + $0x10] sm:$0xff]  ;;  %s1454_s3 = smov [#allocation9]  }
  0x3d   :  { %v1604_v27 = vld [vmem:[#allocation8] ss:$0 sm:$0xff]  ;;  %v315_v46 = vld [vmem:[#allocation3 + $0x18] sm:$0xff]  ;;  %v469_v58 = vld [vmem:[#allocation3 + $0x28] sm:$0xff]  ;;  %s705_s26 = sshll.u32 %s1454_s3, 4  ;;  %s706_s26 = int_to_ptr.vmem [resolvable:$true] %s705_s26 }
  0x3e   :  { %1140 = vmatpush3.bf16.msra.mxu0 %v1538_v7  ;;  %1164 = vmatpush3.bf16.msra.mxu1 %v1538_v7  ;;  %v81_v28 = vld [vmem:[#allocation3] sm:$0xff]  ;;  %v162_v35 = vadd.f32 %v1604_v27, %v161_v34  ;;  %v239_v41 = vadd.f32 %v1604_v27, %v238_v40  ;;  %v316_v47 = vadd.f32 %v1604_v27, %v315_v46  ;;  %v623_v6 = vld [vmem:[#allocation3 + $0x38] sm:$0xff]  ;;  %s1418_s29 = scalar_lea.vmem %s706_s26, 1024  ;;  %p1423_p11 = scmp.lt.s32.totalorder %s706_s26, %s706_s26 }
  0x3f   :  { %1141 = vmatprep.subr.bf16.mxu0 %v1451_v0  ;;  %1165 = vmatprep.subr.bf16.mxu1 %v1451_v0  ;;  %v86_v29 = vadd.f32 %v1604_v27, %v81_v28  ;;  %v392_v52 = vld [vmem:[#allocation3 + $0x20] sm:$0xff]  ;;  %v470_v59 = vadd.f32 %v1604_v27, %v469_v58  ;;  %p1419_p10 = scmp.ne.s32.totalorder %s706_s26, %s1418_s29  ;;  %p1424_p12 = scmp.lt.s32.totalorder %s1418_s29, %s1418_s29 }
  0x40   :  { %v393_v53 = vadd.f32 %v1604_v27, %v392_v52 }
  0x41   :  { %p1425_p13 = por %p1424_p12, %p1423_p11 }
  0x42   :  { %1143 = vmatpush3.bf16.msra.mxu0 %v1544_v10  ;;  %1167 = vmatpush3.bf16.msra.mxu1 %v1544_v10 }
  0x43   :  { %1144 = vmatprep.subr.bf16.mxu0 %v1451_v0  ;;  %1168 = vmatprep.subr.bf16.mxu1 %v1451_v0  ;;  %p1426_p0 = pnand %p1425_p13, %p1419_p10 }
  0x46   :  { %1146 = vmatpush3.bf16.msra.mxu0 %v1550_v13  ;;  %1170 = vmatpush3.bf16.msra.mxu1 %v1550_v13 }
  0x47   :  { %1147 = vmatprep.subr.bf16.mxu0 %v1451_v0  ;;  %1171 = vmatprep.subr.bf16.mxu1 %v1451_v0 }
  0x4a   :  { %1149 = vmatpush3.bf16.msra.mxu0 %v1556_v16  ;;  %1173 = vmatpush3.bf16.msra.mxu1 %v1556_v16 }
  0x4b   :  { %1150 = vmatprep.subr.bf16.mxu0 %v1451_v0  ;;  %1174 = vmatprep.subr.bf16.mxu1 %v1451_v0 }
  0x4e   :  { %1152 = vmatpush3.bf16.msra.mxu0 %v1562_v19  ;;  %1176 = vmatpush3.bf16.msra.mxu1 %v1562_v19 }
  0x4f   :  { %1153 = vmatprep.subr.bf16.mxu0 %v1451_v0  ;;  %1177 = vmatprep.subr.bf16.mxu1 %v1451_v0 }
  0x52   :  { %1155 = vmatpush3.bf16.msra.mxu0 %v1568_v22  ;;  %1179 = vmatpush3.bf16.msra.mxu1 %v1568_v22 }
  0x53   :  { %1156 = vmatprep.subr.bf16.mxu0 %v1451_v0  ;;  %1180 = vmatprep.subr.bf16.mxu1 %v1451_v0 }
  0x56   :  { %1158 = vmatpush3.bf16.msra.mxu0 %v1574_v25  ;;  %1182 = vmatpush3.bf16.msra.mxu1 %v1574_v25 }
  0x57   :  { %1183 = vmatprep.subr.bf16.mxu0 %v1451_v0  ;;  %1207 = vmatprep.subr.bf16.mxu1 %v1451_v0 }
  0x59   :  { %888 = vmatmul.mubr.f32.vlgmr.msra.gmra.mrb[0].mxu0 %v61_v26 }
  0x5a   :  { %1185 = vmatpush3.bf16.msra.mxu0 %v1535_v5  ;;  %957 = vmatprep.mubr.msk.f32.mxu0 %vm1452_vm0, %v1453_v1 }
  0x5b   :  { %1186 = vmatprep.subr.bf16.mxu0 %v1451_v0 }
  0x5e   :  { %1188 = vmatpush3.bf16.msra.mxu0 %v1538_v7 }
  0x5f   :  { %1189 = vmatprep.subr.bf16.mxu0 %v1451_v0 }
  0x62   :  { %1191 = vmatpush3.bf16.msra.mxu0 %v1544_v10 }
  0x63   :  { %1192 = vmatprep.subr.bf16.mxu0 %v1451_v0 }
  0x66   :  { %1194 = vmatpush3.bf16.msra.mxu0 %v1550_v13 }
  0x67   :  { %1195 = vmatprep.subr.bf16.mxu0 %v1451_v0 }
  0x6a   :  { %1197 = vmatpush3.bf16.msra.mxu0 %v1556_v16 }
  0x6b   :  { %1198 = vmatprep.subr.bf16.mxu0 %v1451_v0 }
  0x6e   :  { %1200 = vmatpush3.bf16.msra.mxu0 %v1562_v19 }
  0x6f   :  { %1201 = vmatprep.subr.bf16.mxu0 %v1451_v0 }
  0x72   :  { %1203 = vmatpush3.bf16.msra.mxu0 %v1568_v22 }
  0x73   :  { %1204 = vmatprep.subr.bf16.mxu0 %v1451_v0 }
  0x76   :  { %1206 = vmatpush3.bf16.msra.mxu0 %v1574_v25 }
  0x77   :  { %1231 = vmatprep.subr.bf16.mxu0 %v1451_v0 }
 0x12c   :  { %v153_v30 = vpop.f32.mrb[0].mxu0 }
 0x12d   :  { %v157_v31 = vadd.f32 %v153_v30, %v86_v29  ;;  %v889_v32 = vpop.f32.mrb[1].mxu0 }
 0x12f   :  { %1336 = vtanh.f32 %v157_v31 }
 0x139   :  { %v1337_v33 = vpop.eup %1336 }
 0x13a   :  { %159 = vst [vmem:[#allocation9] sm:$0xff] %v1337_v33  ;;  %923 = vmatmul.mubr.f32.vlgmr.msra.gmra.mrb[0].mxu1 %v1337_v33 }
 0x13b   :  { %1209 = vmatpush3.bf16.msra.mxu1 %v1535_v5  ;;  %992 = vmatprep.mubr.msk.f32.mxu1 %vm1452_vm0, %v1453_v1 }
 0x13c   :  { %1210 = vmatprep.subr.bf16.mxu1 %v1451_v0 }
 0x13f   :  { %1212 = vmatpush3.bf16.msra.mxu1 %v1538_v7 }
 0x140   :  { %1213 = vmatprep.subr.bf16.mxu1 %v1451_v0 }
 0x143   :  { %1215 = vmatpush3.bf16.msra.mxu1 %v1544_v10 }
 0x144   :  { %1216 = vmatprep.subr.bf16.mxu1 %v1451_v0 }
 0x147   :  { %1218 = vmatpush3.bf16.msra.mxu1 %v1550_v13 }
 0x148   :  { %1219 = vmatprep.subr.bf16.mxu1 %v1451_v0 }
 0x14b   :  { %1221 = vmatpush3.bf16.msra.mxu1 %v1556_v16 }
 0x14c   :  { %1222 = vmatprep.subr.bf16.mxu1 %v1451_v0 }
 0x14f   :  { %1224 = vmatpush3.bf16.msra.mxu1 %v1562_v19 }
 0x150   :  { %1225 = vmatprep.subr.bf16.mxu1 %v1451_v0 }
 0x153   :  { %1227 = vmatpush3.bf16.msra.mxu1 %v1568_v22 }
 0x154   :  { %1228 = vmatprep.subr.bf16.mxu1 %v1451_v0 }
 0x157   :  { %1230 = vmatpush3.bf16.msra.mxu1 %v1574_v25 }
 0x158   :  { %1255 = vmatprep.subr.bf16.mxu1 %v1451_v0 }
 0x20d   :  { %v229_v36 = vpop.f32.mrb[0].mxu1 }
 0x20e   :  { %v233_v37 = vadd.f32 %v229_v36, %v162_v35  ;;  %v924_v38 = vpop.f32.mrb[1].mxu1 }
 0x210   :  { %1338 = vtanh.f32 %v233_v37 }
 0x21a   :  { %v1339_v39 = vpop.eup %1338 }
 0x21b   :  { %236 = vst [vmem:[#allocation9 + $0x8] sm:$0xff] %v1339_v39  ;;  %958 = vmatmul.mubr.f32.vlgmr.msra.gmra.mrb[2].mxu0 %v1339_v39 }
 0x21c   :  { %1233 = vmatpush3.bf16.msra.mxu0 %v1535_v5  ;;  %1027 = vmatprep.mubr.msk.f32.mxu0 %vm1452_vm0, %v1453_v1 }
 0x21d   :  { %1234 = vmatprep.subr.bf16.mxu0 %v1451_v0 }
 0x220   :  { %1236 = vmatpush3.bf16.msra.mxu0 %v1538_v7 }
 0x221   :  { %1237 = vmatprep.subr.bf16.mxu0 %v1451_v0 }
 0x224   :  { %1239 = vmatpush3.bf16.msra.mxu0 %v1544_v10 }
 0x225   :  { %1240 = vmatprep.subr.bf16.mxu0 %v1451_v0 }
 0x228   :  { %1242 = vmatpush3.bf16.msra.mxu0 %v1550_v13 }
 0x229   :  { %1243 = vmatprep.subr.bf16.mxu0 %v1451_v0 }
 0x22c   :  { %1245 = vmatpush3.bf16.msra.mxu0 %v1556_v16 }
 0x22d   :  { %1246 = vmatprep.subr.bf16.mxu0 %v1451_v0 }
 0x230   :  { %1248 = vmatpush3.bf16.msra.mxu0 %v1562_v19 }
 0x231   :  { %1249 = vmatprep.subr.bf16.mxu0 %v1451_v0 }
 0x234   :  { %1251 = vmatpush3.bf16.msra.mxu0 %v1568_v22 }
 0x235   :  { %1252 = vmatprep.subr.bf16.mxu0 %v1451_v0 }
 0x238   :  { %1254 = vmatpush3.bf16.msra.mxu0 %v1574_v25 }
 0x239   :  { %1279 = vmatprep.subr.bf16.mxu0 %v1451_v0 }
 0x2ee   :  { %v306_v42 = vpop.f32.mrb[2].mxu0 }
 0x2ef   :  { %v310_v43 = vadd.f32 %v306_v42, %v239_v41  ;;  %v959_v44 = vpop.f32.mrb[3].mxu0 }
 0x2f1   :  { %1340 = vtanh.f32 %v310_v43 }
 0x2fb   :  { %v1341_v45 = vpop.eup %1340 }
 0x2fc   :  { %313 = vst [vmem:[#allocation9 + $0x10] sm:$0xff] %v1341_v45  ;;  %993 = vmatmul.mubr.f32.vlgmr.msra.gmra.mrb[2].mxu1 %v1341_v45 }
 0x2fd   :  { %1257 = vmatpush3.bf16.msra.mxu1 %v1535_v5  ;;  %1062 = vmatprep.mubr.msk.f32.mxu1 %vm1452_vm0, %v1453_v1 }
 0x2fe   :  { %1258 = vmatprep.subr.bf16.mxu1 %v1451_v0 }
 0x301   :  { %1260 = vmatpush3.bf16.msra.mxu1 %v1538_v7 }
 0x302   :  { %1261 = vmatprep.subr.bf16.mxu1 %v1451_v0 }
 0x305   :  { %1263 = vmatpush3.bf16.msra.mxu1 %v1544_v10 }
 0x306   :  { %1264 = vmatprep.subr.bf16.mxu1 %v1451_v0 }
 0x309   :  { %1266 = vmatpush3.bf16.msra.mxu1 %v1550_v13 }
 0x30a   :  { %1267 = vmatprep.subr.bf16.mxu1 %v1451_v0 }
 0x30d   :  { %1269 = vmatpush3.bf16.msra.mxu1 %v1556_v16 }
 0x30e   :  { %1270 = vmatprep.subr.bf16.mxu1 %v1451_v0 }
 0x311   :  { %1272 = vmatpush3.bf16.msra.mxu1 %v1562_v19 }
 0x312   :  { %1273 = vmatprep.subr.bf16.mxu1 %v1451_v0 }
 0x315   :  { %1275 = vmatpush3.bf16.msra.mxu1 %v1568_v22 }
 0x316   :  { %1276 = vmatprep.subr.bf16.mxu1 %v1451_v0 }
 0x319   :  { %1278 = vmatpush3.bf16.msra.mxu1 %v1574_v25 }
 0x31a   :  { %1303 = vmatprep.subr.bf16.mxu1 %v1451_v0 }
 0x3cf   :  { %v383_v48 = vpop.f32.mrb[2].mxu1 }
 0x3d0   :  { %v387_v49 = vadd.f32 %v383_v48, %v316_v47  ;;  %v994_v50 = vpop.f32.mrb[3].mxu1 }
 0x3d2   :  { %1342 = vtanh.f32 %v387_v49 }
 0x3dc   :  { %v1343_v51 = vpop.eup %1342 }
 0x3dd   :  { %390 = vst [vmem:[#allocation9 + $0x18] sm:$0xff] %v1343_v51  ;;  %1028 = vmatmul.mubr.f32.vlgmr.msra.gmra.mrb[4].mxu0 %v1343_v51 }
 0x3de   :  { %1281 = vmatpush3.bf16.msra.mxu0 %v1535_v5  ;;  %1097 = vmatprep.mubr.msk.f32.mxu0 %vm1452_vm0, %v1453_v1 }
 0x3df   :  { %1282 = vmatprep.subr.bf16.mxu0 %v1451_v0 }
 0x3e2   :  { %1284 = vmatpush3.bf16.msra.mxu0 %v1538_v7 }
 0x3e3   :  { %1285 = vmatprep.subr.bf16.mxu0 %v1451_v0 }
 0x3e6   :  { %1287 = vmatpush3.bf16.msra.mxu0 %v1544_v10 }
 0x3e7   :  { %1288 = vmatprep.subr.bf16.mxu0 %v1451_v0 }
 0x3ea   :  { %1290 = vmatpush3.bf16.msra.mxu0 %v1550_v13 }
 0x3eb   :  { %1291 = vmatprep.subr.bf16.mxu0 %v1451_v0 }
 0x3ee   :  { %1293 = vmatpush3.bf16.msra.mxu0 %v1556_v16 }
 0x3ef   :  { %1294 = vmatprep.subr.bf16.mxu0 %v1451_v0 }
 0x3f2   :  { %1296 = vmatpush3.bf16.msra.mxu0 %v1562_v19 }
 0x3f3   :  { %1297 = vmatprep.subr.bf16.mxu0 %v1451_v0 }
 0x3f6   :  { %1299 = vmatpush3.bf16.msra.mxu0 %v1568_v22 }
 0x3f7   :  { %1300 = vmatprep.subr.bf16.mxu0 %v1451_v0 }
 0x3fa   :  { %1302 = vmatpush3.bf16.msra.mxu0 %v1574_v25 }
 0x4b0   :  { %v460_v54 = vpop.f32.mrb[4].mxu0 }
 0x4b1   :  { %v464_v55 = vadd.f32 %v460_v54, %v393_v53  ;;  %v1029_v56 = vpop.f32.mrb[5].mxu0 }
 0x4b3   :  { %1344 = vtanh.f32 %v464_v55 }
 0x4bd   :  { %v1345_v57 = vpop.eup %1344 }
 0x4be   :  { %467 = vst [vmem:[#allocation9 + $0x20] sm:$0xff] %v1345_v57  ;;  %1063 = vmatmul.mubr.f32.vlgmr.msra.gmra.mrb[4].mxu1 %v1345_v57 }
 0x4bf   :  { %1305 = vmatpush3.bf16.msra.mxu1 %v1535_v5  ;;  %1132 = vmatprep.mubr.msk.f32.mxu1 %vm1452_vm0, %v1453_v1  ;;  %v546_v1 = vld [vmem:[#allocation3 + $0x30] sm:$0xff] }
 0x4c0   :  { %1306 = vmatprep.subr.bf16.mxu1 %v1451_v0  ;;  %v547_v2 = vadd.f32 %v1604_v27, %v546_v1 }
 0x4c3   :  { %1308 = vmatpush3.bf16.msra.mxu1 %v1538_v7  ;;  %v624_v7 = vadd.f32 %v1604_v27, %v623_v6 }
 0x4c4   :  { %1309 = vmatprep.subr.bf16.mxu1 %v1451_v0 }
 0x4c7   :  { %1311 = vmatpush3.bf16.msra.mxu1 %v1544_v10 }
 0x4c8   :  { %1312 = vmatprep.subr.bf16.mxu1 %v1451_v0 }
 0x4cb   :  { %1314 = vmatpush3.bf16.msra.mxu1 %v1550_v13 }
 0x4cc   :  { %1315 = vmatprep.subr.bf16.mxu1 %v1451_v0 }
 0x4cf   :  { %1317 = vmatpush3.bf16.msra.mxu1 %v1556_v16 }
 0x4d0   :  { %1318 = vmatprep.subr.bf16.mxu1 %v1451_v0 }
 0x4d3   :  { %1320 = vmatpush3.bf16.msra.mxu1 %v1562_v19 }
 0x4d4   :  { %1321 = vmatprep.subr.bf16.mxu1 %v1451_v0 }
 0x4d7   :  { %1323 = vmatpush3.bf16.msra.mxu1 %v1568_v22 }
 0x4d8   :  { %1324 = vmatprep.subr.bf16.mxu1 %v1451_v0 }
 0x4db   :  { %1326 = vmatpush3.bf16.msra.mxu1 %v1574_v25 }
 0x591   :  { %v537_v60 = vpop.f32.mrb[4].mxu1 }
 0x592   :  { %v541_v61 = vadd.f32 %v537_v60, %v470_v59  ;;  %v1064_v62 = vpop.f32.mrb[5].mxu1 }
 0x594   :  { %1346 = vtanh.f32 %v541_v61 }
 0x59e   :  { %v1347_v63 = vpop.eup %1346 }
 0x59f   :  { %544 = vst [vmem:[#allocation9 + $0x28] sm:$0xff] %v1347_v63  ;;  %1098 = vmatmul.mubr.f32.vlgmr.msra.gmra.mrb[6].mxu0 %v1347_v63 }
 0x672   :  { %v614_v3 = vpop.f32.mrb[6].mxu0 }
 0x673   :  { %v618_v4 = vadd.f32 %v614_v3, %v547_v2  ;;  %v1099_v5 = vpop.f32.mrb[7].mxu0 }
 0x675   :  { %1348 = vtanh.f32 %v618_v4 }
 0x67f   :  { %v1349_v0 = vpop.eup %1348 }
 0x680   :  { %621 = vst [vmem:[#allocation9 + $0x30] sm:$0xff] %v1349_v0  ;;  %1133 = vmatmul.mubr.f32.vlgmr.msra.gmra.mrb[6].mxu1 %v1349_v0 }
 0x753   :  { %v691_v8 = vpop.f32.mrb[6].mxu1 }
 0x754   :  { %v695_v9 = vadd.f32 %v691_v8, %v624_v7  ;;  %v1134_v10 = vpop.f32.mrb[7].mxu1 }
 0x756   :  { %1350 = vtanh.f32 %v695_v9 }
 0x760   :  { %v1351_v11 = vpop.eup %1350 }
 0x761   :  { %698 = vst [vmem:[#allocation9 + $0x38] sm:$0xff] %v1351_v11 }
 0x762   :  { %1429 = shalt.err (!%p1426_p0)
}
 0x763   :  { %s1430_s6 = scalar_lea.hbm %s1721_s4, 1024 }
 0x764   :  { %p1431_p1 = scmp.ne.s32.totalorder %s1721_s4, %s1430_s6  ;;  %p1434_p2 = scmp.lt.u32.totalorder %s1430_s6, %s1721_s4 }
 0x766   :  { %p1436_p3 = pnand %p1434_p2, %p1431_p1 }
 0x768   :  { %1439 = shalt.err (!%p1436_p3)
}
 0x769   :  { %711 = dma.vmem_to_hbm [thread:$0]  %s706_s26, 1024, %s1721_s4, [#allocation5], %s1448_s27, %s1448_s27, %s1449_s28  }
 0x76a   :  { %1444 = dma.done.wait [#allocation5], 1024  }
 0x76b   :  { %1445 = vsyncadd [#allocation5], 4294966272 }
 0x76c   :  { %715 = vsyncpa [#allocation4], 1 }
 0x76d   :  { %716 = vsyncpa [#allocation7], 1 }
 0x76e   :  { %717 = vsyncpa [#allocation5], 1 }

</bundles_post_ra>
